<compile_context>
chip_gen: v6e
topology: v6e:2x2x1
jax: 0.10.0
libtpu: 0.0.40
codegen_flags: <defaults>
</compile_context>

<pallas_src>
import functools

import jax
import jax.numpy as jnp
import numpy as np
from jax.experimental import pallas as pl
from jax.experimental.pallas import tpu as pltpu


# --------------------------------------------------------------------------- #
# Kernel
# --------------------------------------------------------------------------- #
def _so3_head_kernel(temperature, inv_n, n_layers, compute_dtype, *refs):
    """refs = x, mavg, (wT_i, b_i)*n_layers, w_head, b_head, out, acc_scratch."""
    x_ref, mavg_ref = refs[0], refs[1]
    layer_refs = refs[2:2 + 2 * n_layers]
    wh_ref = refs[2 + 2 * n_layers]
    bh_ref = refs[3 + 2 * n_layers]
    out_ref = refs[4 + 2 * n_layers]
    acc_ref = refs[5 + 2 * n_layers]

    # NOTE(correctness): the point-tile axis MUST stay the innermost (fastest)
    # grid axis and the output block index must not depend on it; the scratch
    # accumulation + t==last finalize below rely on that.
    t = pl.program_id(1)
    n_tiles = pl.num_programs(1)

    # (C_in, TILE_L): channels on sublanes, flattened (points*anchors) on lanes.
    # Input stays f32 in HBM/VMEM; the cast to compute_dtype happens at the
    # first MXU operand below (no separate HBM cast pass in the wrapper).
    h = x_ref[...]

    # MLP of 1x1 convs + ReLU, channel-transposed: h = relu(W^T @ h + b).
    # Matmul accumulates in f32; the live inter-layer activation is re-cast to
    # compute_dtype so the largest in-kernel intermediate stays narrow (bf16).
    for l in range(n_layers):
        w = layer_refs[2 * l][...]                  # (C_out, C_in_l), compute_dtype
        b = layer_refs[2 * l + 1][...]              # (C_out, 1), f32
        z = jnp.dot(w, h.astype(w.dtype),
                    preferred_element_type=jnp.float32) + b
        h = jnp.maximum(z, 0.0).astype(compute_dtype)

    # Partial SUM over the points of this tile via one MXU matmul against the
    # exact-0/1 averaging matrix: (C, TILE_L) @ (TILE_L, A) -> (C, A).
    # (The 1/N mean scale is applied once, in f32, in the finalize block.)
    part = jnp.dot(h, mavg_ref[...].astype(h.dtype),
                   preferred_element_type=jnp.float32)

    @pl.when(t == 0)
    def _init():
        acc_ref[...] = jnp.zeros_like(acc_ref)

    acc_ref[...] += part

    @pl.when(t == n_tiles - 1)
    def _finalize():
        xm = acc_ref[...] * inv_n                               # (C, A) f32 mean
        # Fused attention (row 0) + quaternion regressor (rows 1:5) head.
        head = jnp.dot(wh_ref[...], xm.astype(wh_ref.dtype),
                       preferred_element_type=jnp.float32) + bh_ref[...]  # (5, A)
        logits = head[0:1, :] * temperature
        m = jnp.max(logits, axis=-1, keepdims=True)
        e = jnp.exp(logits - m)
        conf = e / jnp.sum(e, axis=-1, keepdims=True)           # exact softmax
        # Fused output: row 0 <- confidence, rows 1:5 <- regressor.
        row = jax.lax.broadcasted_iota(jnp.int32, head.shape, 0)
        out_ref[...] = jnp.where(row == 0,
                                 jnp.broadcast_to(conf, head.shape), head)


# --------------------------------------------------------------------------- #
# Tile sizing from a VMEM budget
# --------------------------------------------------------------------------- #
def _round_up(x, m):
    return ((x + m - 1) // m) * m


def _choose_tile_points(n_points, n_anchors, c_in, c_max, compute_dtype,
                        vmem_budget_bytes):
    """Largest tile_points that divides N, keeps tile_l lane-aligned, and whose
    estimated (padded) VMEM footprint fits the budget."""
    cd_bytes = np.dtype(compute_dtype).itemsize
    act_sub = 16 if cd_bytes == 2 else 8
    # Padded VMEM bytes per unit of tile_l (= points*anchors on the lane axis):
    #   x tile      : double-buffered f32 input, C_in padded to 8 sublanes
    #   mavg        : bf16 0/1 matrix, A padded to 128 lanes (double-buffered)
    #   activations : one f32 matmul result + one compute_dtype live copy
    bytes_per_lane = (2 * _round_up(c_in, 8) * 4
                      + 2 * _round_up(n_anchors, 128) * 2
                      + _round_up(c_max, 8) * 4
                      + _round_up(c_max, act_sub) * cd_bytes)
    fixed = 2 * 1024 * 1024  # weights, head, biases, accumulator, output, slack
    max_tile_l = max((vmem_budget_bytes - fixed) // bytes_per_lane, 1)

    valid = [tp for tp in range(1, n_points + 1)
             if n_points % tp == 0
             and (tp == n_points or (tp * n_anchors) % 128 == 0)]
    fitting = [tp for tp in valid if tp * n_anchors <= max_tile_l]
    return max(fitting) if fitting else min(valid)


# --------------------------------------------------------------------------- #
# Wrapper
# --------------------------------------------------------------------------- #
def so3_outblock_r(feats_nchw, weights, temperature, *,
                   tile_points=None,
                   compute_dtype=jnp.bfloat16,
                   vmem_budget_bytes=36 * 1024 * 1024,
                   vmem_limit_bytes=48 * 1024 * 1024):
    """feats_nchw: (B, C_in, N, A) float32, as the PyTorch module expects."""
    B, C_in, N, A = feats_nchw.shape

    layer_params = weights["mlp"]               # list of (W (Ci, Co), b (1, Co))
    wa, ba = weights["attention"]               # (C, 1), (1, 1)
    wr, br = weights["regressor"]               # (C, 4), (1, 4)
    n_layers = len(layer_params)
    channels = [C_in] + [w.shape[1] for (w, _) in layer_params]
    c_out = channels[-1]
    c_max = max(channels)

    if tile_points is None:
        tile_points = _choose_tile_points(N, A, C_in, c_max, compute_dtype,
                                          vmem_budget_bytes)
    assert N % tile_points == 0, "tile_points must divide N"
    num_tiles = N // tile_points
    tile_l = tile_points * A
    if num_tiles > 1:
        # lane-dim divisibility when the streamed block is not the full array
        assert tile_l % 128 == 0, \
            "tile_points * A must be a multiple of 128 when tiling"

    # NCHW -> (B, C_in, N*A): contiguous collapse, no HBM transpose, no astype
    # pass (the f32 slab is read once by the kernel and cast per-tile).
    x = feats_nchw.reshape(B, C_in, N * A)

    # Channel-transposed weights for h_next = relu(W^T @ h + b); biases f32.
    mlp_w = [(jnp.asarray(w).T.astype(compute_dtype),
              jnp.asarray(b).reshape(-1, 1).astype(jnp.float32))
             for (w, b) in layer_params]
    # Fused head: row 0 = attention, rows 1:5 = regressor.
    wh = jnp.concatenate([wa, wr], axis=1).T.astype(compute_dtype)             # (5, C)
    bh = jnp.concatenate([ba, br], axis=1).reshape(-1, 1).astype(jnp.float32)  # (5, 1)

    # Exact 0/1 averaging matrix, always bf16: M[j, a] = 1 iff j % A == a.
    # (1/N is applied in f32 inside the kernel finalize, so no precision loss.)
    mavg = ((jnp.arange(tile_l)[:, None] % A)
            == jnp.arange(A)[None, :]).astype(jnp.bfloat16)

    inputs = [x, mavg]
    in_specs = [
        pl.BlockSpec((None, C_in, tile_l), lambda b, t: (b, 0, t)),
        # Grid-invariant block (constant index map).  Could be single-buffered
        # with pipeline_mode=pl.Buffered(1); the VMEM budget above already
        # assumes the conservative double-buffered footprint.
        pl.BlockSpec((tile_l, A), lambda b, t: (0, 0)),
    ]
    for w, bias in mlp_w + [(wh, bh)]:
        inputs += [w, bias]
        in_specs += [pl.BlockSpec(w.shape, lambda b, t: (0, 0)),
                     pl.BlockSpec(bias.shape, lambda b, t: (0, 0))]

    # Single fused lane-dense output: (B, 5, A); row 0 = conf, rows 1:5 = y.
    out_shape = jax.ShapeDtypeStruct((B, 5, A), jnp.float32)
    out_specs = pl.BlockSpec((None, 5, A), lambda b, t: (b, 0, 0))

    # Advisory cost estimate (kernel is HBM-bound on reading the feature slab).
    mm_flops = 2 * B * N * A * (sum(ci * co for ci, co in
                                    zip(channels[:-1], channels[1:])) + c_out)
    head_flops = 2 * B * c_out * 5 * A
    bytes_accessed = (x.size * x.dtype.itemsize
                      + sum(w.size * w.dtype.itemsize + b.size * 4
                            for w, b in mlp_w)
                      + wh.size * wh.dtype.itemsize + bh.size * 4
                      + mavg.size * 2
                      + B * 5 * A * 4)

    kernel = functools.partial(_so3_head_kernel, float(temperature),
                               1.0 / float(N), n_layers, compute_dtype)
    head_out = pl.pallas_call(
        kernel,
        out_shape=out_shape,
        grid_spec=pltpu.PrefetchScalarGridSpec(
            num_scalar_prefetch=0,
            # Point-tile axis must stay innermost (reduction into acc scratch).
            grid=(B, num_tiles),
            in_specs=in_specs,
            out_specs=out_specs,
            scratch_shapes=[pltpu.VMEM((c_out, A), jnp.float32)],
        ),
        compiler_params=pltpu.CompilerParams(
            dimension_semantics=("parallel", "arbitrary"),
            vmem_limit_bytes=vmem_limit_bytes),
        cost_estimate=pl.CostEstimate(flops=int(mm_flops + head_flops),
                                      transcendentals=int(B * A),
                                      bytes_accessed=int(bytes_accessed)),
    )(*inputs)

    confidence = head_out[:, 0, :]              # (B, A), == .view(B, A) in torch
    y = head_out[:, 1:5, :]                     # (B, 4, A), as Conv2d would emit
    return confidence, y


# --------------------------------------------------------------------------- #
# Pure-JAX reference + test harness
# --------------------------------------------------------------------------- #
def _reference(feats, weights, temperature):
    """Pure-JAX mirror of the PyTorch forward, for verification."""
    x = feats
    for w, b in weights["mlp"]:
        x = jnp.einsum("bcna,cd->bdna", x, w) + b.reshape(1, -1, 1, 1)
        x = jnp.maximum(x, 0.0)
    xm = x.mean(axis=2)                                              # (B, C, A)
    wa, ba = weights["attention"]
    att = jnp.einsum("bca,cd->bda", xm, wa) + ba.reshape(1, -1, 1)   # (B, 1, A)
    conf = jax.nn.softmax(att * temperature, axis=2).reshape(
        xm.shape[0], xm.shape[2])
    wr, br = weights["regressor"]
    y = jnp.einsum("bca,cd->bda", xm, wr) + br.reshape(1, -1, 1)     # (B, 4, A)
    return conf, y


def _init_weights(key, c_in, mlp):
    ws = {}
    layers = []
    for c in mlp:
        key, k1, k2 = jax.random.split(key, 3)
        layers.append((0.1 * jax.random.normal(k1, (c_in, c), jnp.float32),
                       0.1 * jax.random.normal(k2, (1, c), jnp.float32)))
        c_in = c
    ws["mlp"] = layers
    key, k1, k2, k3, k4 = jax.random.split(key, 5)
    ws["attention"] = (0.1 * jax.random.normal(k1, (c_in, 1), jnp.float32),
                       0.1 * jax.random.normal(k2, (1, 1), jnp.float32))
    ws["regressor"] = (0.1 * jax.random.normal(k3, (c_in, 4), jnp.float32),
                       0.1 * jax.random.normal(k4, (1, 4), jnp.float32))
    return ws


if __name__ == "__main__":
    # params = {'dim_in': 4, 'mlp': [16, 32], 'temperature': 3.0, 'representation': 'quat'}
    B, C_IN, N, A = 2, 4, 16, 8
    MLP = [16, 32]
    TEMPERATURE = 3.0

    key = jax.random.PRNGKey(0)
    key, kf = jax.random.split(key)
    feats = jax.random.normal(kf, (B, C_IN, N, A), jnp.float32)   # PyTorch NCHW
    weights = _init_weights(key, C_IN, MLP)

    conf_ref, y_ref = _reference(feats, weights, TEMPERATURE)

    # f32 path: tight verification of the kernel math.
    conf32, y32 = so3_outblock_r(feats, weights, TEMPERATURE,
                                 compute_dtype=jnp.float32)
    jax.block_until_ready((conf32, y32))
    np.testing.assert_allclose(np.asarray(conf32), np.asarray(conf_ref),
                               rtol=2e-3, atol=1e-5)
    np.testing.assert_allclose(np.asarray(y32), np.asarray(y_ref),
                               rtol=2e-3, atol=1e-5)

    # Default (bf16 MXU operands) path: production configuration, looser tol.
    confidence, y = so3_outblock_r(feats, weights, TEMPERATURE)
    jax.block_until_ready((confidence, y))
    np.testing.assert_allclose(np.asarray(confidence), np.asarray(conf_ref),
                               rtol=1e-1, atol=5e-3)
    np.testing.assert_allclose(np.asarray(y), np.asarray(y_ref),
                               rtol=1e-1, atol=2e-2)

    assert confidence.shape == (B, A) and y.shape == (B, 4, A)
    print("KERNEL_OK")
</pallas_src>

<mosaic_0001>
module attributes {stable_mosaic.version = 11 : i64} {
  func.func @_so3_head_kernel(%arg0: i32, %arg1: i32, %arg2: memref<1x4x128xf32, #tpu.memory_space<vmem>>, %arg3: memref<128x8xbf16, #tpu.memory_space<vmem>>, %arg4: memref<16x4xf32, #tpu.memory_space<vmem>>, %arg5: memref<16x1xf32, #tpu.memory_space<vmem>>, %arg6: memref<32x16xf32, #tpu.memory_space<vmem>>, %arg7: memref<32x1xf32, #tpu.memory_space<vmem>>, %arg8: memref<5x32xf32, #tpu.memory_space<vmem>>, %arg9: memref<5x1xf32, #tpu.memory_space<vmem>>, %arg10: memref<1x5x8xf32, #tpu.memory_space<vmem>>, %arg11: memref<32x8xf32, #tpu.memory_space<vmem>>) attributes {dimension_semantics = [#tpu.dimension_semantics<parallel>, #tpu.dimension_semantics<arbitrary>], iteration_bounds = array<i64: 2, 1>, scalar_prefetch = 0 : i64, scratch_operands = 1 : i64, tpu.core_type = #tpu.core_type<tc>, window_params = [{transform_indices = @transform_0, window_bounds = array<i64: 1, 4, 128>}, {pipeline_mode = #tpu.pipeline_mode<synchronous>, transform_indices = @transform_1, window_bounds = array<i64: 128, 8>}, {pipeline_mode = #tpu.pipeline_mode<synchronous>, transform_indices = @transform_2, window_bounds = array<i64: 16, 4>}, {pipeline_mode = #tpu.pipeline_mode<synchronous>, transform_indices = @transform_3, window_bounds = array<i64: 16, 1>}, {pipeline_mode = #tpu.pipeline_mode<synchronous>, transform_indices = @transform_4, window_bounds = array<i64: 32, 16>}, {pipeline_mode = #tpu.pipeline_mode<synchronous>, transform_indices = @transform_5, window_bounds = array<i64: 32, 1>}, {pipeline_mode = #tpu.pipeline_mode<synchronous>, transform_indices = @transform_6, window_bounds = array<i64: 5, 32>}, {pipeline_mode = #tpu.pipeline_mode<synchronous>, transform_indices = @transform_7, window_bounds = array<i64: 5, 1>}, {transform_indices = @transform_8, window_bounds = array<i64: 1, 5, 8>}]} {
    %c0 = arith.constant 0 : index
    %c0_0 = arith.constant 0 : index
    %c0_1 = arith.constant 0 : index
    %0 = vector.load %arg2[%c0, %c0_0, %c0_1] : memref<1x4x128xf32, #tpu.memory_space<vmem>>, vector<1x4x128xf32>
    %1 = vector.shape_cast %0 : vector<1x4x128xf32> to vector<4x128xf32>
    %c0_2 = arith.constant 0 : index
    %c0_3 = arith.constant 0 : index
    %2 = vector.load %arg4[%c0_2, %c0_3] : memref<16x4xf32, #tpu.memory_space<vmem>>, vector<16x4xf32>
    %c0_4 = arith.constant 0 : index
    %c0_5 = arith.constant 0 : index
    %3 = vector.load %arg5[%c0_4, %c0_5] : memref<16x1xf32, #tpu.memory_space<vmem>>, vector<16x1xf32>
    %cst = arith.constant dense<0.000000e+00> : vector<16x128xf32>
    %4 = tpu.matmul %2, %1, %cst {dimension_numbers = #tpu.dot_dimension_numbers<[1], [0], [0], [1], [0, 0, 1, 1], [], []>} : vector<16x4xf32>, vector<4x128xf32>, vector<16x128xf32> -> vector<16x128xf32>
    %5 = vector.broadcast %3 : vector<16x1xf32> to vector<16x128xf32>
    %6 = arith.addf %4, %5 : vector<16x128xf32>
    %cst_6 = arith.constant 0.000000e+00 : f32
    %7 = vector.broadcast %cst_6 : f32 to vector<16x128xf32>
    %8 = arith.maximumf %6, %7 : vector<16x128xf32>
    %c0_7 = arith.constant 0 : index
    %c0_8 = arith.constant 0 : index
    %9 = vector.load %arg6[%c0_7, %c0_8] : memref<32x16xf32, #tpu.memory_space<vmem>>, vector<32x16xf32>
    %c0_9 = arith.constant 0 : index
    %c0_10 = arith.constant 0 : index
    %10 = vector.load %arg7[%c0_9, %c0_10] : memref<32x1xf32, #tpu.memory_space<vmem>>, vector<32x1xf32>
    %cst_11 = arith.constant dense<0.000000e+00> : vector<32x128xf32>
    %11 = tpu.matmul %9, %8, %cst_11 {dimension_numbers = #tpu.dot_dimension_numbers<[1], [0], [0], [1], [0, 0, 1, 1], [], []>} : vector<32x16xf32>, vector<16x128xf32>, vector<32x128xf32> -> vector<32x128xf32>
    %12 = vector.broadcast %10 : vector<32x1xf32> to vector<32x128xf32>
    %13 = arith.addf %11, %12 : vector<32x128xf32>
    %cst_12 = arith.constant 0.000000e+00 : f32
    %14 = vector.broadcast %cst_12 : f32 to vector<32x128xf32>
    %15 = arith.maximumf %13, %14 : vector<32x128xf32>
    %c0_13 = arith.constant 0 : index
    %c0_14 = arith.constant 0 : index
    %16 = vector.load %arg3[%c0_13, %c0_14] : memref<128x8xbf16, #tpu.memory_space<vmem>>, vector<128x8xbf16>
    %17 = arith.extf %16 : vector<128x8xbf16> to vector<128x8xf32>
    %cst_15 = arith.constant dense<0.000000e+00> : vector<32x8xf32>
    %18 = tpu.matmul %15, %17, %cst_15 {dimension_numbers = #tpu.dot_dimension_numbers<[1], [0], [0], [1], [0, 0, 1, 1], [], []>} : vector<32x128xf32>, vector<128x8xf32>, vector<32x8xf32> -> vector<32x8xf32>
    %c0_i32 = arith.constant 0 : i32
    %19 = arith.cmpi eq, %arg1, %c0_i32 : i32
    %20 = arith.extui %19 : i1 to i32
    %c0_i32_16 = arith.constant 0 : i32
    %21 = arith.cmpi ne, %20, %c0_i32_16 : i32
    scf.if %21 {
      %cst_23 = arith.constant 0.000000e+00 : f32
      %28 = vector.broadcast %cst_23 : f32 to vector<32x8xf32>
      %c0_24 = arith.constant 0 : index
      %c0_25 = arith.constant 0 : index
      %29 = vector.load %arg11[%c0_24, %c0_25] : memref<32x8xf32, #tpu.memory_space<vmem>>, vector<32x8xf32>
      tpu.vector_store %arg11[%c0_24, %c0_25], %28 {strides = array<i32>} : memref<32x8xf32, #tpu.memory_space<vmem>>, vector<32x8xf32>,
    } else {
    }
    %c0_17 = arith.constant 0 : index
    %c0_18 = arith.constant 0 : index
    %22 = vector.load %arg11[%c0_17, %c0_18] : memref<32x8xf32, #tpu.memory_space<vmem>>, vector<32x8xf32>
    %23 = arith.addf %22, %18 : vector<32x8xf32>
    %c0_19 = arith.constant 0 : index
    %c0_20 = arith.constant 0 : index
    %24 = vector.load %arg11[%c0_19, %c0_20] : memref<32x8xf32, #tpu.memory_space<vmem>>, vector<32x8xf32>
    tpu.vector_store %arg11[%c0_19, %c0_20], %23 {strides = array<i32>} : memref<32x8xf32, #tpu.memory_space<vmem>>, vector<32x8xf32>,
    %c0_i32_21 = arith.constant 0 : i32
    %25 = arith.cmpi eq, %arg1, %c0_i32_21 : i32
    %26 = arith.extui %25 : i1 to i32
    %c0_i32_22 = arith.constant 0 : i32
    %27 = arith.cmpi ne, %26, %c0_i32_22 : i32
    scf.if %27 {
      %c0_23 = arith.constant 0 : index
      %c0_24 = arith.constant 0 : index
      %28 = vector.load %arg11[%c0_23, %c0_24] : memref<32x8xf32, #tpu.memory_space<vmem>>, vector<32x8xf32>
      %cst_25 = arith.constant 6.250000e-02 : f32
      %29 = vector.broadcast %cst_25 : f32 to vector<32x8xf32>
      %30 = arith.mulf %28, %29 : vector<32x8xf32>
      %c0_26 = arith.constant 0 : index
      %c0_27 = arith.constant 0 : index
      %31 = vector.load %arg8[%c0_26, %c0_27] : memref<5x32xf32, #tpu.memory_space<vmem>>, vector<5x32xf32>
      %cst_28 = arith.constant dense<0.000000e+00> : vector<5x8xf32>
      %32 = tpu.matmul %31, %30, %cst_28 {dimension_numbers = #tpu.dot_dimension_numbers<[1], [0], [0], [1], [0, 0, 1, 1], [], []>} : vector<5x32xf32>, vector<32x8xf32>, vector<5x8xf32> -> vector<5x8xf32>
      %c0_29 = arith.constant 0 : index
      %c0_30 = arith.constant 0 : index
      %33 = vector.load %arg9[%c0_29, %c0_30] : memref<5x1xf32, #tpu.memory_space<vmem>>, vector<5x1xf32>
      %34 = vector.broadcast %33 : vector<5x1xf32> to vector<5x8xf32>
      %35 = arith.addf %32, %34 : vector<5x8xf32>
      %36 = vector.extract_strided_slice %35 {offsets = [0, 0], sizes = [1, 8], strides = [1, 1]} : vector<5x8xf32> to vector<1x8xf32>
      %cst_31 = arith.constant 3.000000e+00 : f32
      %37 = vector.broadcast %cst_31 : f32 to vector<1x8xf32>
      %38 = arith.mulf %36, %37 : vector<1x8xf32>
      %cst_32 = arith.constant dense<0xFF800000> : vector<1xf32>
      %39 = vector.multi_reduction <maximumf>, %38, %cst_32 [1] : vector<1x8xf32> to vector<1xf32>
      %40 = vector.shape_cast %39 : vector<1xf32> to vector<1x1xf32>
      %41 = vector.broadcast %40 : vector<1x1xf32> to vector<1x8xf32>
      %42 = arith.subf %38, %41 : vector<1x8xf32>
      %43 = math.exp %42 : vector<1x8xf32>
      %cst_33 = arith.constant dense<0.000000e+00> : vector<1xf32>
      %44 = vector.multi_reduction <add>, %43, %cst_33 [1] : vector<1x8xf32> to vector<1xf32>
      %45 = vector.shape_cast %44 : vector<1xf32> to vector<1x1xf32>
      %46 = vector.broadcast %45 : vector<1x1xf32> to vector<1x8xf32>
      %47 = arith.divf %43, %46 : vector<1x8xf32>
      %48 = tpu.iota {dimensions = array<i32: 0>} : vector<5x8xi32>
      %c0_i32_34 = arith.constant 0 : i32
      %49 = vector.broadcast %c0_i32_34 : i32 to vector<5x8xi32>
      %50 = arith.cmpi eq, %48, %49 : vector<5x8xi32>
      %51 = vector.shape_cast %47 : vector<1x8xf32> to vector<1x8xf32>
      %52 = vector.broadcast %51 : vector<1x8xf32> to vector<5x8xf32>
      %53 = arith.select %50, %52, %35 : vector<5x8xi1>, vector<5x8xf32>
      %c0_35 = arith.constant 0 : index
      %c0_36 = arith.constant 0 : index
      %c0_37 = arith.constant 0 : index
      %54 = vector.load %arg10[%c0_35, %c0_36, %c0_37] : memref<1x5x8xf32, #tpu.memory_space<vmem>>, vector<1x5x8xf32>
      %55 = vector.shape_cast %54 : vector<1x5x8xf32> to vector<5x8xf32>
      %56 = vector.shape_cast %53 : vector<5x8xf32> to vector<1x5x8xf32>
      tpu.vector_store %arg10[%c0_35, %c0_36, %c0_37], %56 {strides = array<i32>} : memref<1x5x8xf32, #tpu.memory_space<vmem>>, vector<1x5x8xf32>,
    } else {
    }
    return
  }
  func.func @transform_0(%arg0: i32, %arg1: i32) -> (i32, i32, i32) {
    %c0_i32 = arith.constant 0 : i32
    %c0_i32_0 = arith.constant 0 : i32
    return %arg0, %c0_i32, %arg1 : i32, i32, i32
  }
  func.func @transform_1(%arg0: i32, %arg1: i32) -> (i32, i32) {
    %c0_i32 = arith.constant 0 : i32
    %c0_i32_0 = arith.constant 0 : i32
    %c0_i32_1 = arith.constant 0 : i32
    return %c0_i32, %c0_i32_0 : i32, i32
  }
  func.func @transform_2(%arg0: i32, %arg1: i32) -> (i32, i32) {
    %c0_i32 = arith.constant 0 : i32
    %c0_i32_0 = arith.constant 0 : i32
    %c0_i32_1 = arith.constant 0 : i32
    return %c0_i32, %c0_i32_0 : i32, i32
  }
  func.func @transform_3(%arg0: i32, %arg1: i32) -> (i32, i32) {
    %c0_i32 = arith.constant 0 : i32
    %c0_i32_0 = arith.constant 0 : i32
    %c0_i32_1 = arith.constant 0 : i32
    return %c0_i32, %c0_i32_0 : i32, i32
  }
  func.func @transform_4(%arg0: i32, %arg1: i32) -> (i32, i32) {
    %c0_i32 = arith.constant 0 : i32
    %c0_i32_0 = arith.constant 0 : i32
    %c0_i32_1 = arith.constant 0 : i32
    return %c0_i32, %c0_i32_0 : i32, i32
  }
  func.func @transform_5(%arg0: i32, %arg1: i32) -> (i32, i32) {
    %c0_i32 = arith.constant 0 : i32
    %c0_i32_0 = arith.constant 0 : i32
    %c0_i32_1 = arith.constant 0 : i32
    return %c0_i32, %c0_i32_0 : i32, i32
  }
  func.func @transform_6(%arg0: i32, %arg1: i32) -> (i32, i32) {
    %c0_i32 = arith.constant 0 : i32
    %c0_i32_0 = arith.constant 0 : i32
    %c0_i32_1 = arith.constant 0 : i32
    return %c0_i32, %c0_i32_0 : i32, i32
  }
  func.func @transform_7(%arg0: i32, %arg1: i32) -> (i32, i32) {
    %c0_i32 = arith.constant 0 : i32
    %c0_i32_0 = arith.constant 0 : i32
    %c0_i32_1 = arith.constant 0 : i32
    return %c0_i32, %c0_i32_0 : i32, i32
  }
  func.func @transform_8(%arg0: i32, %arg1: i32) -> (i32, i32, i32) {
    %c0_i32 = arith.constant 0 : i32
    %c0_i32_0 = arith.constant 0 : i32
    %c0_i32_1 = arith.constant 0 : i32
    return %arg0, %c0_i32, %c0_i32_0 : i32, i32, i32
  }
}

</mosaic_0001>

<bundles_post_ra>
// kernel: tpu_custom_call.1
= control target key start
LH: loop header
LB: loop body
LE: loop exit
PB: predicated region body
PF: predicated region fallthrough
CT: control target
= control target key end

     0   :  { %s1134_s27 = smov 0   ;;  %s1136_s28 = smov 0   ;;  %s1251_s0 = inlined_call_operand.vmem [shape: f32[2,4,128], index: 0, kind: input, shape index: {}]   ;;  %s1252_s1 = inlined_call_operand.vmem [shape: bf16[128,8], index: 1, kind: input, shape index: {}]   ;;  %s1253_s2 = inlined_call_operand.vmem [shape: f32[16,4], index: 2, kind: input, shape index: {}]   ;;  %s1254_s3 = inlined_call_operand.vmem [shape: f32[16,1], index: 3, kind: input, shape index: {}]   ;;  %s1255_s4 = inlined_call_operand.vmem [shape: f32[32,16], index: 4, kind: input, shape index: {}]   ;;  %s1256_s5 = inlined_call_operand.vmem [shape: f32[32,1], index: 5, kind: input, shape index: {}]   ;;  %s1257_s6 = inlined_call_operand.vmem [shape: f32[5,32], index: 6, kind: input, shape index: {}]   ;;  %s1258_s7 = inlined_call_operand.vmem [shape: f32[5,1], index: 7, kind: input, shape index: {}]   ;;  %s1259_s8 = inlined_call_operand.vmem [shape: f32[2,5,8], index: 8, kind: output, shape index: {}]  }
   0x1   :  { %s1138_s29 = smov 0  }
   0x2 LB: > { %s30_s30 = sadd.s32 1, %s1080_s28  ;;  %p879_p0 = scmp.ge.s32.totalorder %s1084_s29, 1  ;;  %s1084_s29 = sphi %s1138_s29, %s18_s29   ;;  %s1080_s28 = sphi %s1136_s28, %s1261_s28   ;;  %s1076_s27 = sphi %s1134_s27, %s1260_s27  }
   0x3   : > { %p32_p1 = scmp.ge.s32.totalorder %s30_s30, 2  ;;  %p278_p2 = scmp.lt.s32.totalorder %s1084_s29, 3 }
   0x5   : > { %s1263_s30 = smov (%p32_p1, %s30_s30), 0  ;;  %p279_p3 = pnand %p879_p0, %p278_p2 }
   0x6   : > { %p313_p4 = scmp.lt.s32.totalorder (!%p279_p3), %s1076_s27, 1 }
   0x7   : > { %282 = sbr.rel (%p279_p3) target bundleno = 1148 (0x47c), region = 52 }
   0xc   : > { %v325_v0 = vld [vmem:[%s1253_s2] sm:$0xff]  ;;  %vm339_vm0 = vcmask 31744   ;;  %v1086_v1 = vmov 0   ;;  %v328_v2 = vld [vmem:[%s1254_s3 + $0x8] sm:$0xff]  ;;  %s1265_s27 = smov (!%p313_p4, %s1076_s27), 1  ;;  %vm346_vm1 = vcmask 1043456  }
   0xd   : > { %967 = vmatprep.mubr.msk.f32.mxu1 %vm339_vm0, %v325_v0  ;;  %1056 = vset.pattern.permute.xlu0 %v1086_v1  ;;  %v327_v3 = vld [vmem:[%s1254_s3] sm:$0xff]  ;;  %s880_s15 = sshll.u32 %s1265_s27, 2  ;;  %v326_v5 = vld [vmem:[%s1253_s2 + $0x8] sm:$0xff]  ;;  %v433_v6 = vld [vmem:[%s1256_s5 + $0x10] sm:$0xff]  ;;  %vm455_vm2 = vcmask 130048   ;;  %vm678_vm3 = vcmask 64512  }
   0xe   : > { %336 = vperm.xlu0 %1056, %v328_v2   ;;  %1057 = vset.pattern.permute.xlu1 %v1086_v1  ;;  %s319_s18 = scalar_lea.vmem %s1251_s0, %s880_s15  ;;  %v708_v7 = vld [vmem:[%s1258_s7] sm:$0x1f]  ;;  %v930_v10 = vld [vmem:[%s1252_s1 + $0x38] sm:$0xff]   ;;  %v929_v11 = vld [vmem:[%s1252_s1 + $0x30] sm:$0xff]   ;;  %v1087_v63 = vmov 0.0   ;;  %vm1088_vm4 = vmmov 0  }
   0xf   : > { %v324_v4 = vld [vmem:[%s319_s18] sm:$0xf]  ;;  %v432_v12 = vld [vmem:[%s1256_s5 + $0x8] sm:$0xff]  ;;  %v922_v13 = vunpack.c.l.bf16 %v930_v10  ;;  %v923_v14 = vunpack.c.h.bf16 %v930_v10  ;;  %v919_v15 = vunpack.c.h.bf16 %v929_v11  ;;  %v434_v17 = vld [vmem:[%s1256_s5 + $0x18] sm:$0xff]  ;;  %v918_v18 = vunpack.c.l.bf16 %v929_v11  ;;  %680 = vst.msk [vmem:[#allocation2 + $0x8] sm:$0xff] %vm678_vm3, %v1087_v63  ;;  %s881_s21 = sshll.u32 %s1265_s27, 3 }
  0x10   : > { %965 = vmatprep.subr.msk.mxu1 %vm346_vm1, %v324_v4  ;;  %v427_v8 = vld [vmem:[%s1255_s4] sm:$0xff]  ;;  %v928_v16 = vld [vmem:[%s1252_s1 + $0x28] sm:$0xff]   ;;  %v926_v23 = vld [vmem:[%s1252_s1 + $0x18] sm:$0xff]   ;;  %679 = vst.msk [vmem:[#allocation2] sm:$0xff] %vm678_vm3, %v1087_v63  ;;  %vm714_vm5 = vcmask 261120   ;;  %vm789_vm6 = vcmask 57344   ;;  %s323_s24 = scalar_lea.vmem %s1259_s8, %s881_s21 }
  0x11   : > { %966 = vmatpush3.msk.msra.mxu1 %vm346_vm1, %v324_v4  ;;  %v431_v9 = vld [vmem:[%s1256_s5] sm:$0xff]  ;;  %980 = vmatprep.subr.mxu0 %v923_v14  ;;  %v915_v19 = vunpack.c.h.bf16 %v928_v16  ;;  %v914_v21 = vunpack.c.l.bf16 %v928_v16  ;;  %v907_v25 = vunpack.c.h.bf16 %v926_v23  ;;  %v925_v26 = vld [vmem:[%s1252_s1 + $0x10] sm:$0xff]   ;;  %v906_v27 = vunpack.c.l.bf16 %v926_v23  ;;  %v428_v38 = vld [vmem:[%s1255_s4 + $0x8] sm:$0xff]  ;;  %681 = vst.msk [vmem:[#allocation2 + $0x10] sm:$0xff] %vm678_vm3, %v1087_v63 }
  0x12   : > { %331 = vperm.xlu0 %1056, %v327_v3   ;;  %968 = vmatmul.mubr.msk.f32.vlgmr.msra.gmra.mxu1 %vm339_vm0, %v326_v5  ;;  %v927_v20 = vld [vmem:[%s1252_s1 + $0x20] sm:$0xff]   ;;  %v903_v28 = vunpack.c.h.bf16 %v925_v26  ;;  %v902_v29 = vunpack.c.l.bf16 %v925_v26  ;;  %v429_v39 = vld [vmem:[%s1255_s4 + $0x10] sm:$0xff]  ;;  %v430_v40 = vld [vmem:[%s1255_s4 + $0x18] sm:$0xff]  ;;  %682 = vst.msk [vmem:[#allocation2 + $0x18] sm:$0xff] %vm678_vm3, %v1087_v63  ;;  %vm809_vm8 = vcmask 61440  }
  0x13   : > { %974 = vmatprep.mubr.msk.f32.mxu1 %vm455_vm2, %v427_v8  ;;  %437 = vperm.xlu1 %1057, %v431_v9   ;;  %v911_v22 = vunpack.c.h.bf16 %v927_v20  ;;  %v910_v24 = vunpack.c.l.bf16 %v927_v20  ;;  %v924_v41 = vld [vmem:[%s1252_s1 + $0x8] sm:$0xff]   ;;  %v893_v44 = vld [vmem:[%s1252_s1] sm:$0xff]  }
  0x14   : > { %981 = vmatpush3.msra.mxu0 %v923_v14  ;;  %v899_v42 = vunpack.c.h.bf16 %v924_v41  ;;  %v898_v43 = vunpack.c.l.bf16 %v924_v41  ;;  %v895_v45 = vunpack.c.h.bf16 %v893_v44  ;;  %v894_v46 = vunpack.c.l.bf16 %v893_v44  ;;  %v707_v20 = vld [vmem:[%s1257_s6] sm:$0x1f] }
  0x15   : > { %982 = vmatprep.subr.mxu0 %v922_v13 }
  0x16   : > { %447 = vperm.xlu0 %1056, %v433_v6   ;;  %983 = vmatpush3.msra.mxu0 %v922_v13  ;;  %v684_v0 = vld [vmem:[#allocation2 + $0x8] sm:$0xff] }
  0x17   : > { %442 = vperm.xlu1 %1057, %v432_v12   ;;  %984 = vmatprep.subr.mxu0 %v919_v15  ;;  %v683_v2 = vld [vmem:[#allocation2] sm:$0xff] }
  0x18   : > { %985 = vmatpush3.msra.mxu0 %v919_v15  ;;  %v685_v8 = vld [vmem:[#allocation2 + $0x10] sm:$0xff] }
  0x19   : > { %986 = vmatprep.subr.mxu0 %v918_v18  ;;  %v686_v5 = vld [vmem:[#allocation2 + $0x18] sm:$0xff] }
  0x1a   : > { %711 = vperm.xlu0 %1056, %v708_v7   ;;  %987 = vmatpush3.msra.mxu0 %v918_v18 }
  0x1b   : > { %452 = vperm.xlu1 %1057, %v434_v17   ;;  %988 = vmatprep.subr.mxu0 %v915_v19 }
  0x1c   : > { %989 = vmatpush3.msra.mxu0 %v915_v19 }
  0x1d   : > { %990 = vmatprep.subr.mxu0 %v914_v21 }
  0x1e   : > { %991 = vmatpush3.msra.mxu0 %v914_v21 }
  0x1f   : > { %992 = vmatprep.subr.mxu0 %v911_v22 }
  0x20   : > { %993 = vmatpush3.msra.mxu0 %v911_v22 }
  0x21   : > { %994 = vmatprep.subr.mxu0 %v910_v24 }
  0x22   : > { %995 = vmatpush3.msra.mxu0 %v910_v24 }
  0x23   : > { %996 = vmatprep.subr.mxu0 %v907_v25 }
  0x24   : > { %997 = vmatpush3.msra.mxu0 %v907_v25 }
  0x25   : > { %998 = vmatprep.subr.mxu0 %v906_v27 }
  0x26   : > { %999 = vmatpush3.msra.mxu0 %v906_v27 }
  0x27   : > { %1000 = vmatprep.subr.mxu0 %v903_v28 }
  0x28   : > { %1001 = vmatpush3.msra.mxu0 %v903_v28 }
  0x29   : > { %1002 = vmatprep.subr.mxu0 %v902_v29 }
  0x2a   : > { %1003 = vmatpush3.msra.mxu0 %v902_v29 }
  0x2b   : > { %1004 = vmatprep.subr.mxu0 %v899_v42 }
  0x2c   : > { %1005 = vmatpush3.msra.mxu0 %v899_v42 }
  0x2d   : > { %1006 = vmatprep.subr.mxu0 %v898_v43 }
  0x2e   : > { %1007 = vmatpush3.msra.mxu0 %v898_v43 }
  0x2f   : > { %1008 = vmatprep.subr.mxu0 %v895_v45 }
  0x30   : > { %1009 = vmatpush3.msra.mxu0 %v895_v45 }
  0x31   : > { %1010 = vmatprep.subr.mxu0 %v894_v46 }
  0x32   : > { %1011 = vmatpush3.msra.mxu0 %v894_v46 }
  0x89   : > { %v337_v30 = vpop.permute.xlu0 %336 }
  0x8d   : > { %v332_v33 = vpop.permute.xlu0 %331 }
  0x8e   : > { %v438_v47 = vpop.permute.xlu1 %437 }
  0x91   : > { %v448_v56 = vpop.permute.xlu0 %447 }
  0x92   : > { %v443_v48 = vpop.permute.xlu1 %442 }
  0x95   : > { %v712_v21 = vpop.permute.xlu0 %711 }
  0x96   : > { %v453_v54 = vpop.permute.xlu1 %452 }
  0xd2   : > { %v969_v31 = vpop.f32.mrf.mxu1 }
  0xd3   : > { %v422_v32 = vadd.f32 %v969_v31, %v337_v30 }
  0xd4   : > { %v416_v34 = vpop.f32.mrf.mxu1 }
  0xd5   : > { %v426_v35 = vmax.f32 %v422_v32, 0.0  ;;  %v417_v36 = vadd.f32 %v416_v34, %v332_v33  ;;  %v801_v33 = vlaneseq }
  0xd7   : > { %v425_v37 = vmax.f32 %v417_v36, 0.0  ;;  %970 = vmatprep.subr.mxu1 %v426_v35  ;;  %v802_v34 = vshrl.u32 %v801_v33, 7 }
  0xd8   : > { %971 = vmatpush3.msra.mxu1 %v426_v35 }
  0xd9   : > { %972 = vmatprep.subr.mxu1 %v425_v37  ;;  %v806_v35 = vsub.s32 0, %v802_v34  ;;  %vm803_vm7 = vcmp.eq.s32.totalorder %v802_v34, 0 }
  0xda   : > { %973 = vmatpush3.msra.mxu1 %v425_v37 }
  0xdb   : > { %975 = vmatmul.mubr.msk.f32.vlgmr.msra.gmra.mxu1 %vm455_vm2, %v428_v38  ;;  %1018 = vmatprep.subr.mxu1 %v1087_v63 }
  0xdc   : > { %977 = vmatprep.mubr.msk.f32.mxu1 %vm455_vm2, %v429_v39 }
  0xdf   : > { %978 = vmatmul.mubr.msk.f32.gmra.mxu1 %vm455_vm2, %v430_v40 }
  0xe0   : > { %1026 = vmatprep.mubr.msk.f32.mxu1 %vm1088_vm4, %v1087_v63 }
 0x19b   : > { %v976_v49 = vpop.f32.mrf.mxu1 }
 0x19c   : > { %v540_v50 = vadd.f32 %v976_v49, %v443_v48 }
 0x19d   : > { %v534_v51 = vpop.f32.mrf.mxu1 }
 0x19e   : > { %v535_v52 = vadd.f32 %v534_v51, %v438_v47  ;;  %v554_v57 = vmax.f32 %v540_v50, 0.0 }
 0x19f   : > { %v979_v53 = vpop.f32.mrf.mxu1 }
 0x1a0   : > { %v553_v55 = vmax.f32 %v535_v52, 0.0  ;;  %v550_v58 = vadd.f32 %v979_v53, %v453_v54 }
 0x1a1   : > { %v544_v59 = vpop.f32.mrf.mxu1 }
 0x1a2   : > { %v545_v60 = vadd.f32 %v544_v59, %v448_v56  ;;  %1012 = vmatprep.mubr.f32.mxu0 %v553_v55  ;;  %v556_v62 = vmax.f32 %v550_v58, 0.0 }
 0x1a3   : > { %1013 = vmatmul.mubr.f32.vlgmr.msra.gmra.mxu0 %v554_v57 }
 0x1a4   : > { %v555_v61 = vmax.f32 %v545_v60, 0.0 }
 0x1a6   : > { %1015 = vmatprep.mubr.f32.mxu0 %v555_v61 }
 0x1a7   : > { %1016 = vmatmul.mubr.f32.gmra.mxu0 %v556_v62 }
 0x263   : > { %v1014_v1 = vpop.f32.mrf.mxu0 }
 0x264   : > { %v688_v3 = vadd.f32 %v1014_v1, %v684_v0 }
 0x265   : > { %v655_v4 = vpop.f32.mrf.mxu0 }
 0x266   : > { %693 = vst.msk [vmem:[#allocation2 + $0x8] sm:$0xff] %vm678_vm3, %v688_v3  ;;  %v687_v6 = vadd.f32 %v683_v2, %v655_v4 }
 0x267   : > { %v1017_v7 = vpop.f32.mrf.mxu0 }
 0x268   : > { %692 = vst.msk [vmem:[#allocation2] sm:$0xff] %vm678_vm3, %v687_v6  ;;  %v690_v9 = vadd.f32 %v1017_v7, %v686_v5 }
 0x269   : > { %v665_v10 = vpop.f32.mrf.mxu0 }
 0x26a   : > { %695 = vst.msk [vmem:[#allocation2 + $0x18] sm:$0xff] %vm678_vm3, %v690_v9  ;;  %v689_v11 = vadd.f32 %v685_v8, %v665_v10 }
 0x26c   : > { %694 = vst.msk [vmem:[#allocation2 + $0x10] sm:$0xff] %vm678_vm3, %v689_v11 }
 0x26d   : > { %v700_v15 = vld [vmem:[#allocation2 + $0x8] sm:$0xff] }
 0x26e   : > { %v704_v18 = vmul.f32 0.0625, %v700_v15 }
 0x26f   : > { %v699_v17 = vld [vmem:[#allocation2] sm:$0xff] }
 0x270   : > { %v703_v19 = vmul.f32 0.0625, %v699_v17 }
 0x271   : > { %v702_v12 = vld [vmem:[#allocation2 + $0x18] sm:$0xff] }
 0x272   : > { %v706_v13 = vmul.f32 0.0625, %v702_v12 }
 0x273   : > { %v701_v14 = vld [vmem:[#allocation2 + $0x10] sm:$0xff] }
 0x274   : > { %1019 = vmatpush3.msra.mxu1 %v706_v13  ;;  %v705_v16 = vmul.f32 0.0625, %v701_v14 }
 0x275   : > { %1020 = vmatprep.subr.mxu1 %v1087_v63 }
 0x276   : > { %1021 = vmatpush3.msra.mxu1 %v705_v16 }
 0x277   : > { %1022 = vmatprep.subr.mxu1 %v1087_v63 }
 0x278   : > { %1023 = vmatpush3.msra.mxu1 %v704_v18 }
 0x279   : > { %1024 = vmatprep.subr.mxu1 %v1087_v63 }
 0x27a   : > { %1025 = vmatpush3.msra.mxu1 %v703_v19 }
 0x27b   : > { %1027 = vmatmul.mubr.msk.f32.vlgmr.msra.gmra.mxu1 %vm714_vm5, %v707_v20 }
 0x33b   : > { %v784_v22 = vpop.f32.mrf.mxu1 }
 0x33c   : > { %v785_v23 = vadd.f32 %v784_v22, %v712_v21 }
 0x33d   : > { %v1028_v24 = vpop.f32.mrf.mxu1 }
 0x33e   : > { %v788_v25 = vmul.f32 3.0, %v785_v23 }
 0x340   : > { %v790_v26 = vsel %vm789_vm6, %v788_v25, -inf }
 0x341   : > { %791 = vmax.xlane.f32.xlu1 %v790_v26 }
 0x3ca   : > { %v792_v27 = vpop.xlane.xlu1 %791 }
 0x3cb   : > { %v793_v28 = vsub.f32 %v788_v25, %v792_v27 }
 0x3cd   : > { %v794_v29 = vmul.f32 1.442695, %v793_v28 }
 0x3cf   : > { %1058 = vpow2.f32 %v794_v29 }
 0x3dc   : > { %v1059_v30 = vpop.eup %1058 }
 0x3dd   : > { %v796_v31 = vsel %vm789_vm6, %v1059_v30, 0.0 }
 0x3de   : > { %797 = vadd.xlane.f32.xlu0 %v796_v31 }
 0x467   : > { %v798_v32 = vpop.xlane.xlu0 %797 }
 0x468   : > { %1060 = vrcp.f32 %v798_v32 }
 0x475   : > { %v1061_v36 = vpop.eup %1060 }
 0x476   : > { %v800_v37 = vmul.f32 %v1061_v36, %v1059_v30 }
 0x478   : > { %v807_v38 = vrot.slane %v800_v37, %v806_v35 }
 0x47a   : > { %v808_v39 = vsel %vm803_vm7, %v807_v38, %v785_v23 }
 0x47b   : > { %810 = vst.msk [vmem:[%s323_s24] sm:$0x1f] %vm809_vm8, %v808_v39 }
 0x47c PF: > { %s18_s29 = sadd.s32 1, %s1084_s29   ;;  %s1260_s27 = smov %s1080_s28 }
 0x47d   : > { %p15_p5 = scmp.ge.s32.totalorder %s18_s29, 4   ;;  %s1261_s28 = smov %s1263_s30 }
 0x47f   :  { %17 = sbr.rel (!%p15_p5) target bundleno = 2 (0x2), region = 90 }

</bundles_post_ra>
